<compile_context>
chip_gen: v6e
topology: v6e:2x2x1
jax: 0.10.0
libtpu: 0.0.40
codegen_flags: <defaults>
</compile_context>

<pallas_src>
import functools

import jax
import jax.numpy as jnp
from jax import lax
from jax.experimental import pallas as pl
from jax.experimental.pallas import tpu as pltpu
import numpy as np

FEAT_DIM = 512            # CLIP embedding dim (Adapter(512, 2))
HID_DIM = FEAT_DIM // 2   # reduction = 2 -> 256
VISUAL_RATIO = 0.8
TEXT_RATIO = 0.0
LOGIT_SCALE_INIT = float(np.log(1.0 / 0.07))  # CLIP default logit_scale param


def _round_up(x, m):
    return (x + m - 1) // m * m


def _pick_batch_tiling(batch, block_b):
    """Sublane-aligned batch tile that minimizes padded rows."""
    b8 = _round_up(batch, 8)
    if b8 <= block_b:
        return b8, b8
    n_tiles = (b8 + block_b - 1) // block_b
    tb = _round_up((b8 + n_tiles - 1) // n_tiles, 8)
    return tb, tb * n_tiles


def _custom_clip_kernel(scale_ref,          # SMEM (1,1) raw logit_scale param
                        imgf_ref,           # VMEM (tb, 512)   image features (f32)
                        txtf_ref,           # VMEM (Np, 512)   text features  (f32)
                        wi1_ref, wi2_ref,   # VMEM image-adapter weights (bf16)
                        *rest,              # [wt1, wt2,] out_ref
                        visual_ratio, text_ratio):
    if text_ratio != 0.0:
        wt1_ref, wt2_ref, out_ref = rest
    else:
        (out_ref,) = rest

    imgf = imgf_ref[...]                    # f32
    txtf = txtf_ref[...]                    # f32

    # --- Adapter(image_features): relu(relu(x @ W1) @ W2), no biases ---
    # bf16 operands, f32 accumulation on the MXU.
    h_i = jnp.maximum(
        jnp.dot(imgf.astype(jnp.bfloat16), wi1_ref[...],
                preferred_element_type=jnp.float32), 0.0)
    x_i = jnp.maximum(
        jnp.dot(h_i.astype(jnp.bfloat16), wi2_ref[...],
                preferred_element_type=jnp.float32), 0.0)
    img = visual_ratio * x_i + (1.0 - visual_ratio) * imgf

    # --- Adapter_text(text_features) + ratio mix ---
    # Dropped entirely at trace time when text_ratio == 0 (dead work).
    if text_ratio != 0.0:
        h_t = jnp.maximum(
            jnp.dot(txtf.astype(jnp.bfloat16), wt1_ref[...],
                    preferred_element_type=jnp.float32), 0.0)
        x_t = jnp.maximum(
            jnp.dot(h_t.astype(jnp.bfloat16), wt2_ref[...],
                    preferred_element_type=jnp.float32), 0.0)
        txt = text_ratio * x_t + (1.0 - text_ratio) * txtf
    else:
        txt = txtf

    # --- L2 normalize along feature dim (rsqrt * x; EUP path, no divide).
    #     exp(logit_scale) folded into the (tb,1) image inverse-norm so the
    #     output tile never needs a separate scaling pass. ---
    scale = jnp.exp(scale_ref[0, 0])
    img_inv = lax.rsqrt(jnp.sum(img * img, axis=-1, keepdims=True)) * scale
    txt_inv = lax.rsqrt(jnp.sum(txt * txt, axis=-1, keepdims=True))
    img_n = (img * img_inv).astype(jnp.bfloat16)
    txt_n = (txt * txt_inv).astype(jnp.bfloat16)

    # --- logits = scaled image @ text.T (NT contraction, bf16 operands,
    #     f32 accumulation → single MXU pass, no explicit transpose) ---
    out_ref[...] = lax.dot_general(
        img_n, txt_n, (((1,), (1,)), ((), ())),
        preferred_element_type=jnp.float32)


@functools.partial(
    jax.jit, static_argnames=("visual_ratio", "text_ratio", "block_b"))
def custom_clip_logits(logit_scale, img_feat, txt_feat, wi1, wi2,
                       wt1=None, wt2=None, *,
                       visual_ratio=VISUAL_RATIO, text_ratio=TEXT_RATIO,
                       block_b=256):
    """Adapter + ratio mix + L2 norm + scaled logits as one Pallas kernel.

    img_feat: (B, 512), txt_feat: (N, 512); adapter weights in (in, out)
    layout.  The batch is tiled over a 1-D grid (parallel → megacore-able);
    text features and weights stay VMEM-resident via constant index_maps.
    The class dim is padded to a multiple of 128 for lane-dense stores.
    """
    B, D = img_feat.shape
    N = txt_feat.shape[0]

    tb, b_pad = _pick_batch_tiling(B, block_b)
    n_pad = _round_up(N, 128)               # lane-dense output columns

    imgf = img_feat.astype(jnp.float32)
    txtf = txt_feat.astype(jnp.float32)
    if b_pad != B:   # pad with 1.0 so padded rows stay finite through the norm
        imgf = jnp.pad(imgf, ((0, b_pad - B), (0, 0)), constant_values=1.0)
    if n_pad != N:
        txtf = jnp.pad(txtf, ((0, n_pad - N), (0, 0)), constant_values=1.0)

    # bf16 weights: halves the weight DMA; f32 accumulation in-kernel.
    wi1 = wi1.astype(jnp.bfloat16)
    wi2 = wi2.astype(jnp.bfloat16)

    use_text_adapter = (text_ratio != 0.0)

    const_map = lambda i: (0, 0)
    in_specs = [
        pl.BlockSpec(memory_space=pltpu.MemorySpace.SMEM),        # logit_scale
        pl.BlockSpec((tb, D), lambda i: (i, 0)),                  # image tile
        pl.BlockSpec((n_pad, D), const_map),                      # text (resident)
        pl.BlockSpec((D, HID_DIM), const_map),                    # wi1 (resident)
        pl.BlockSpec((HID_DIM, D), const_map),                    # wi2 (resident)
    ]
    args = [logit_scale.astype(jnp.float32), imgf, txtf, wi1, wi2]
    if use_text_adapter:
        in_specs += [pl.BlockSpec((D, HID_DIM), const_map),
                     pl.BlockSpec((HID_DIM, D), const_map)]
        args += [wt1.astype(jnp.bfloat16), wt2.astype(jnp.bfloat16)]

    kernel = functools.partial(_custom_clip_kernel,
                               visual_ratio=float(visual_ratio),
                               text_ratio=float(text_ratio))

    logits = pl.pallas_call(
        kernel,
        out_shape=jax.ShapeDtypeStruct((b_pad, n_pad), jnp.float32),
        grid_spec=pltpu.PrefetchScalarGridSpec(
            num_scalar_prefetch=0,
            grid=(b_pad // tb,),
            in_specs=in_specs,
            out_specs=pl.BlockSpec((tb, n_pad), lambda i: (i, 0)),
        ),
        compiler_params=pltpu.CompilerParams(
            dimension_semantics=("parallel",)),
    )(*args)

    return logits[:B, :N]


def init_params(key):
    """Deterministic synthetic parameters (shapes from CustomCLIP.__init__)."""
    ks = jax.random.split(key, 6)
    # Adapter weights stored pre-transposed to (in, out) so the kernel does x @ W.
    wi1 = 0.02 * jax.random.normal(ks[0], (FEAT_DIM, HID_DIM), jnp.float32)
    wi2 = 0.02 * jax.random.normal(ks[1], (HID_DIM, FEAT_DIM), jnp.float32)
    wt1 = 0.02 * jax.random.normal(ks[2], (FEAT_DIM, HID_DIM), jnp.float32)
    wt2 = 0.02 * jax.random.normal(ks[3], (HID_DIM, FEAT_DIM), jnp.float32)
    return ks[4], ks[5], wi1, wi2, wt1, wt2


def synthetic_encoders(key_img_enc, key_txt, image, num_classes):
    """Glue standing in for clip_model.visual / clip_model.encode_text."""
    # TODO(synk): the real CLIP ViT image encoder and the tokenizer + text
    # transformer have no compact Pallas equivalent here; replaced by a
    # deterministic linear projection / synthetic class embeddings.
    B = image.shape[0]
    flat = image.reshape(B, -1)                          # NCHW -> (B, C*H*W)
    w_vis = 0.05 * jax.random.normal(
        key_img_enc, (flat.shape[1], FEAT_DIM), jnp.float32)
    image_features = flat @ w_vis                        # (B, 512)
    text_features = jax.random.normal(
        key_txt, (num_classes, FEAT_DIM), jnp.float32)   # (N, 512)
    return image_features, text_features


if __name__ == "__main__":
    key = jax.random.PRNGKey(0)
    k_img, k_params = jax.random.split(key)

    # Small NCHW image batch: batch=2, channels=3, spatial=16x16.
    image = jax.random.normal(k_img, (2, 3, 16, 16), jnp.float32)
    num_classes = 8

    k_enc, k_txt, wi1, wi2, wt1, wt2 = init_params(k_params)
    img_feat, txt_feat = synthetic_encoders(k_enc, k_txt, image, num_classes)

    logit_scale = jnp.full((1, 1), LOGIT_SCALE_INIT, jnp.float32)

    logits = custom_clip_logits(
        logit_scale, img_feat, txt_feat, wi1, wi2, wt1, wt2)
    jax.block_until_ready(logits)
    assert logits.shape == (2, num_classes)

    # Pure-JAX reference of the kernelized portion (same bf16 precision regime,
    # same scale-folding as the kernel; scale commutes so semantics match the
    # PyTorch module).
    def ref(imgf, txtf):
        w1 = wi1.astype(jnp.bfloat16)
        w2 = wi2.astype(jnp.bfloat16)
        h = jnp.maximum(jnp.dot(imgf.astype(jnp.bfloat16), w1,
                                preferred_element_type=jnp.float32), 0.0)
        x = jnp.maximum(jnp.dot(h.astype(jnp.bfloat16), w2,
                                preferred_element_type=jnp.float32), 0.0)
        img = VISUAL_RATIO * x + (1 - VISUAL_RATIO) * imgf
        txt = txtf  # text_ratio == 0.0
        scale = jnp.exp(LOGIT_SCALE_INIT)
        img_n = (img * (scale / jnp.linalg.norm(img, axis=-1, keepdims=True))
                 ).astype(jnp.bfloat16)
        txt_n = (txt / jnp.linalg.norm(txt, axis=-1, keepdims=True)
                 ).astype(jnp.bfloat16)
        return lax.dot_general(img_n, txt_n, (((1,), (1,)), ((), ())),
                               preferred_element_type=jnp.float32)

    expected = ref(img_feat, txt_feat)
    np.testing.assert_allclose(np.asarray(logits), np.asarray(expected),
                               rtol=2e-3, atol=2e-3)
    print("KERNEL_OK")
</pallas_src>

<mosaic_0001>
module attributes {stable_mosaic.version = 11 : i64} {
  func.func @_custom_clip_kernel(%arg0: i32, %arg1: memref<1x1xf32, #tpu.memory_space<smem>>, %arg2: memref<8x512xf32, #tpu.memory_space<vmem>>, %arg3: memref<128x512xf32, #tpu.memory_space<vmem>>, %arg4: memref<512x256xbf16, #tpu.memory_space<vmem>>, %arg5: memref<256x512xbf16, #tpu.memory_space<vmem>>, %arg6: memref<8x128xf32, #tpu.memory_space<vmem>>) attributes {dimension_semantics = [#tpu.dimension_semantics<parallel>], iteration_bounds = array<i64: 1>, scalar_prefetch = 0 : i64, scratch_operands = 0 : i64, tpu.core_type = #tpu.core_type<tc>, window_params = [{transform_indices = @transform_0, window_bounds = array<i64: 1, 1>}, {transform_indices = @transform_1, window_bounds = array<i64: 8, 512>}, {pipeline_mode = #tpu.pipeline_mode<synchronous>, transform_indices = @transform_2, window_bounds = array<i64: 128, 512>}, {pipeline_mode = #tpu.pipeline_mode<synchronous>, transform_indices = @transform_3, window_bounds = array<i64: 512, 256>}, {pipeline_mode = #tpu.pipeline_mode<synchronous>, transform_indices = @transform_4, window_bounds = array<i64: 256, 512>}, {transform_indices = @transform_5, window_bounds = array<i64: 8, 128>}]} {
    %c0 = arith.constant 0 : index
    %c0_0 = arith.constant 0 : index
    %0 = vector.load %arg2[%c0, %c0_0] : memref<8x512xf32, #tpu.memory_space<vmem>>, vector<8x512xf32>
    %c0_1 = arith.constant 0 : index
    %c0_2 = arith.constant 0 : index
    %1 = vector.load %arg3[%c0_1, %c0_2] : memref<128x512xf32, #tpu.memory_space<vmem>>, vector<128x512xf32>
    %2 = arith.truncf %0 : vector<8x512xf32> to vector<8x512xbf16>
    %c0_3 = arith.constant 0 : index
    %c0_4 = arith.constant 0 : index
    %3 = vector.load %arg4[%c0_3, %c0_4] : memref<512x256xbf16, #tpu.memory_space<vmem>>, vector<512x256xbf16>
    %cst = arith.constant dense<0.000000e+00> : vector<8x256xf32>
    %4 = tpu.matmul %2, %3, %cst {dimension_numbers = #tpu.dot_dimension_numbers<[1], [0], [0], [1], [0, 0, 1, 1], [], []>} : vector<8x512xbf16>, vector<512x256xbf16>, vector<8x256xf32> -> vector<8x256xf32>
    %cst_5 = arith.constant 0.000000e+00 : f32
    %5 = vector.broadcast %cst_5 : f32 to vector<8x256xf32>
    %6 = arith.maximumf %4, %5 : vector<8x256xf32>
    %7 = arith.truncf %6 : vector<8x256xf32> to vector<8x256xbf16>
    %c0_6 = arith.constant 0 : index
    %c0_7 = arith.constant 0 : index
    %8 = vector.load %arg5[%c0_6, %c0_7] : memref<256x512xbf16, #tpu.memory_space<vmem>>, vector<256x512xbf16>
    %cst_8 = arith.constant dense<0.000000e+00> : vector<8x512xf32>
    %9 = tpu.matmul %7, %8, %cst_8 {dimension_numbers = #tpu.dot_dimension_numbers<[1], [0], [0], [1], [0, 0, 1, 1], [], []>} : vector<8x256xbf16>, vector<256x512xbf16>, vector<8x512xf32> -> vector<8x512xf32>
    %cst_9 = arith.constant 0.000000e+00 : f32
    %10 = vector.broadcast %cst_9 : f32 to vector<8x512xf32>
    %11 = arith.maximumf %9, %10 : vector<8x512xf32>
    %cst_10 = arith.constant 8.000000e-01 : f32
    %12 = vector.broadcast %cst_10 : f32 to vector<8x512xf32>
    %13 = arith.mulf %12, %11 : vector<8x512xf32>
    %cst_11 = arith.constant 2.000000e-01 : f32
    %14 = vector.broadcast %cst_11 : f32 to vector<8x512xf32>
    %15 = arith.mulf %14, %0 : vector<8x512xf32>
    %16 = arith.addf %13, %15 : vector<8x512xf32>
    %c0_12 = arith.constant 0 : index
    %c0_13 = arith.constant 0 : index
    %17 = memref.load %arg1[%c0_12, %c0_13] : memref<1x1xf32, #tpu.memory_space<smem>>
    %18 = math.exp %17 : f32
    %19 = arith.mulf %16, %16 : vector<8x512xf32>
    %cst_14 = arith.constant dense<0.000000e+00> : vector<8xf32>
    %20 = vector.multi_reduction <add>, %19, %cst_14 [1] : vector<8x512xf32> to vector<8xf32>
    %21 = vector.shape_cast %20 : vector<8xf32> to vector<8x1xf32>
    %22 = math.rsqrt %21 : vector<8x1xf32>
    %23 = vector.broadcast %18 : f32 to vector<8x1xf32>
    %24 = arith.mulf %22, %23 : vector<8x1xf32>
    %25 = arith.mulf %1, %1 : vector<128x512xf32>
    %cst_15 = arith.constant dense<0.000000e+00> : vector<128xf32>
    %26 = vector.multi_reduction <add>, %25, %cst_15 [1] : vector<128x512xf32> to vector<128xf32>
    %27 = vector.shape_cast %26 : vector<128xf32> to vector<128x1xf32>
    %28 = math.rsqrt %27 : vector<128x1xf32>
    %29 = vector.broadcast %24 : vector<8x1xf32> to vector<8x512xf32>
    %30 = arith.mulf %16, %29 : vector<8x512xf32>
    %31 = arith.truncf %30 : vector<8x512xf32> to vector<8x512xbf16>
    %32 = vector.broadcast %28 : vector<128x1xf32> to vector<128x512xf32>
    %33 = arith.mulf %1, %32 : vector<128x512xf32>
    %34 = arith.truncf %33 : vector<128x512xf32> to vector<128x512xbf16>
    %cst_16 = arith.constant dense<0.000000e+00> : vector<8x128xf32>
    %35 = tpu.matmul %31, %34, %cst_16 {dimension_numbers = #tpu.dot_dimension_numbers<[1], [1], [0], [0], [0, 0, 1, 0], [], []>} : vector<8x512xbf16>, vector<128x512xbf16>, vector<8x128xf32> -> vector<8x128xf32>
    %c0_17 = arith.constant 0 : index
    %c0_18 = arith.constant 0 : index
    %36 = vector.load %arg6[%c0_17, %c0_18] : memref<8x128xf32, #tpu.memory_space<vmem>>, vector<8x128xf32>
    tpu.vector_store %arg6[%c0_17, %c0_18], %35 {strides = array<i32>} : memref<8x128xf32, #tpu.memory_space<vmem>>, vector<8x128xf32>,
    return
  }
  func.func @transform_0(%arg0: i32) -> (i32, i32) {
    %c0_i32 = arith.constant 0 : i32
    %c0_i32_0 = arith.constant 0 : i32
    %c0_i32_1 = arith.constant 0 : i32
    return %c0_i32, %c0_i32_0 : i32, i32
  }
  func.func @transform_1(%arg0: i32) -> (i32, i32) {
    %c0_i32 = arith.constant 0 : i32
    %c0_i32_0 = arith.constant 0 : i32
    return %arg0, %c0_i32 : i32, i32
  }
  func.func @transform_2(%arg0: i32) -> (i32, i32) {
    %c0_i32 = arith.constant 0 : i32
    %c0_i32_0 = arith.constant 0 : i32
    %c0_i32_1 = arith.constant 0 : i32
    return %c0_i32, %c0_i32_0 : i32, i32
  }
  func.func @transform_3(%arg0: i32) -> (i32, i32) {
    %c0_i32 = arith.constant 0 : i32
    %c0_i32_0 = arith.constant 0 : i32
    %c0_i32_1 = arith.constant 0 : i32
    return %c0_i32, %c0_i32_0 : i32, i32
  }
  func.func @transform_4(%arg0: i32) -> (i32, i32) {
    %c0_i32 = arith.constant 0 : i32
    %c0_i32_0 = arith.constant 0 : i32
    %c0_i32_1 = arith.constant 0 : i32
    return %c0_i32, %c0_i32_0 : i32, i32
  }
  func.func @transform_5(%arg0: i32) -> (i32, i32) {
    %c0_i32 = arith.constant 0 : i32
    %c0_i32_0 = arith.constant 0 : i32
    return %arg0, %c0_i32 : i32, i32
  }
}

</mosaic_0001>

<bundles_post_ra>
// kernel: custom_clip_logits.1
= control target key start
LH: loop header
LB: loop body
LE: loop exit
PB: predicated region body
PF: predicated region fallthrough
CT: control target
= control target key end

     0   :  { %s2740_s3 = inlined_call_operand.vmem [shape: bf16[512,256], index: 3, kind: input, shape index: {}]   ;;  %s2741_s1 = inlined_call_operand.vmem [shape: f32[8,512], index: 1, kind: input, shape index: {}]   ;;  %s2742_s4 = inlined_call_operand.vmem [shape: bf16[256,512], index: 4, kind: input, shape index: {}]   ;;  %s2743_s2 = inlined_call_operand.vmem [shape: f32[128,512], index: 2, kind: input, shape index: {}]   ;;  %s2744_s0 = inlined_call_operand.<no memory space> [shape: f32[1,1], index: 0, kind: input, shape index: {}]   ;;  %s2745_s5 = inlined_call_operand.vmem [shape: f32[8,128], index: 5, kind: output, shape index: {}]  }
   0x1   :  { %v1542_v0 = vld [vmem:[%s2740_s3 + $0x74] ss:$8 sps:$4 sm:$0xff]   ;;  %v1546_v2 = vld [vmem:[%s2740_s3 + $0x70] ss:$8 sps:$4 sm:$0xff]   ;;  %v1548_v4 = vld [vmem:[%s2740_s3 + $0x64] ss:$8 sps:$4 sm:$0xff]  }
   0x2   :  { %v1544_v1 = vld [vmem:[%s2740_s3 + $0x174] ss:$8 sps:$4 sm:$0xff]   ;;  %478 = vmatprep.subr.bf16.mxu0 %v1542_v0  ;;  %v1547_v3 = vld [vmem:[%s2740_s3 + $0x170] ss:$8 sps:$4 sm:$0xff]   ;;  %v1550_v5 = vld [vmem:[%s2740_s3 + $0x164] ss:$8 sps:$4 sm:$0xff]  }
   0x3   :  { %519 = vmatprep.subr.bf16.mxu1 %v1544_v1  ;;  %479 = vmatpush1.bf16.msra.mxu0 %v1546_v2  ;;  %v1552_v6 = vld [vmem:[%s2740_s3 + $0x60] ss:$8 sps:$4 sm:$0xff]   ;;  %v1554_v8 = vld [vmem:[%s2740_s3 + $0x54] ss:$8 sps:$4 sm:$0xff]   ;;  %v1558_v10 = vld [vmem:[%s2740_s3 + $0x50] ss:$8 sps:$4 sm:$0xff]  }
   0x4   :  { %520 = vmatpush1.bf16.msra.mxu1 %v1547_v3  ;;  %480 = vmatprep.subr.bf16.mxu0 %v1548_v4  ;;  %v1553_v7 = vld [vmem:[%s2740_s3 + $0x160] ss:$8 sps:$4 sm:$0xff]   ;;  %v1556_v9 = vld [vmem:[%s2740_s3 + $0x154] ss:$8 sps:$4 sm:$0xff]   ;;  %v1559_v11 = vld [vmem:[%s2740_s3 + $0x150] ss:$8 sps:$4 sm:$0xff]  }
   0x5   :  { %521 = vmatprep.subr.bf16.mxu1 %v1550_v5  ;;  %v1560_v12 = vld [vmem:[%s2740_s3 + $0x44] ss:$8 sps:$4 sm:$0xff]   ;;  %v1564_v14 = vld [vmem:[%s2740_s3 + $0x40] ss:$8 sps:$4 sm:$0xff]   ;;  %v1566_v16 = vld [vmem:[%s2740_s3 + $0x34] ss:$8 sps:$4 sm:$0xff]  }
   0x6   :  { %v1562_v13 = vld [vmem:[%s2740_s3 + $0x144] ss:$8 sps:$4 sm:$0xff]   ;;  %v1565_v15 = vld [vmem:[%s2740_s3 + $0x140] ss:$8 sps:$4 sm:$0xff]   ;;  %v1568_v17 = vld [vmem:[%s2740_s3 + $0x134] ss:$8 sps:$4 sm:$0xff]  }
   0x7   :  { %481 = vmatpush1.bf16.msra.mxu0 %v1552_v6  ;;  %v1570_v18 = vld [vmem:[%s2740_s3 + $0x30] ss:$8 sps:$4 sm:$0xff]   ;;  %v1572_v20 = vld [vmem:[%s2740_s3 + $0x24] ss:$8 sps:$4 sm:$0xff]   ;;  %v1576_v22 = vld [vmem:[%s2740_s3 + $0x20] ss:$8 sps:$4 sm:$0xff]  }
   0x8   :  { %522 = vmatpush1.bf16.msra.mxu1 %v1553_v7  ;;  %482 = vmatprep.subr.bf16.mxu0 %v1554_v8  ;;  %v1571_v19 = vld [vmem:[%s2740_s3 + $0x130] ss:$8 sps:$4 sm:$0xff]   ;;  %v1574_v21 = vld [vmem:[%s2740_s3 + $0x124] ss:$8 sps:$4 sm:$0xff]   ;;  %v1577_v23 = vld [vmem:[%s2740_s3 + $0x120] ss:$8 sps:$4 sm:$0xff]  }
   0x9   :  { %523 = vmatprep.subr.bf16.mxu1 %v1556_v9  ;;  %v1578_v24 = vld [vmem:[%s2740_s3 + $0x14] ss:$8 sps:$4 sm:$0xff]   ;;  %v1582_v26 = vld [vmem:[%s2740_s3 + $0x10] ss:$8 sps:$4 sm:$0xff]   ;;  %v1584_v28 = vld [vmem:[%s2740_s3 + $0x4] ss:$8 sps:$4 sm:$0xff]  }
   0xa   :  { %v1580_v25 = vld [vmem:[%s2740_s3 + $0x114] ss:$8 sps:$4 sm:$0xff]   ;;  %v1583_v27 = vld [vmem:[%s2740_s3 + $0x110] ss:$8 sps:$4 sm:$0xff]   ;;  %v1586_v29 = vld [vmem:[%s2740_s3 + $0x104] ss:$8 sps:$4 sm:$0xff]  }
   0xb   :  { %483 = vmatpush1.bf16.msra.mxu0 %v1558_v10  ;;  %v1588_v30 = vld [vmem:[%s2740_s3] ss:$8 sps:$4 sm:$0xff]   ;;  %v1590_v32 = vld [vmem:[%s2740_s3 + $0xf4] ss:$8 sps:$4 sm:$0xff]   ;;  %v1594_v34 = vld [vmem:[%s2740_s3 + $0xf0] ss:$8 sps:$4 sm:$0xff]  }
   0xc   :  { %524 = vmatpush1.bf16.msra.mxu1 %v1559_v11  ;;  %484 = vmatprep.subr.bf16.mxu0 %v1560_v12  ;;  %v1589_v31 = vld [vmem:[%s2740_s3 + $0x100] ss:$8 sps:$4 sm:$0xff]   ;;  %v1592_v33 = vld [vmem:[%s2740_s3 + $0x1f4] ss:$8 sps:$4 sm:$0xff]   ;;  %v1595_v35 = vld [vmem:[%s2740_s3 + $0x1f0] ss:$8 sps:$4 sm:$0xff]  }
   0xd   :  { %525 = vmatprep.subr.bf16.mxu1 %v1562_v13  ;;  %v1596_v36 = vld [vmem:[%s2740_s3 + $0xe4] ss:$8 sps:$4 sm:$0xff]   ;;  %v1600_v38 = vld [vmem:[%s2740_s3 + $0xe0] ss:$8 sps:$4 sm:$0xff]   ;;  %v1602_v40 = vld [vmem:[%s2740_s3 + $0xd4] ss:$8 sps:$4 sm:$0xff]  }
   0xe   :  { %v1598_v37 = vld [vmem:[%s2740_s3 + $0x1e4] ss:$8 sps:$4 sm:$0xff]   ;;  %v1601_v39 = vld [vmem:[%s2740_s3 + $0x1e0] ss:$8 sps:$4 sm:$0xff]   ;;  %v1604_v41 = vld [vmem:[%s2740_s3 + $0x1d4] ss:$8 sps:$4 sm:$0xff]  }
   0xf   :  { %485 = vmatpush1.bf16.msra.mxu0 %v1564_v14  ;;  %v1606_v42 = vld [vmem:[%s2740_s3 + $0xd0] ss:$8 sps:$4 sm:$0xff]   ;;  %v1608_v44 = vld [vmem:[%s2740_s3 + $0xc4] ss:$8 sps:$4 sm:$0xff]   ;;  %v1612_v47 = vld [vmem:[%s2740_s3 + $0xc0] ss:$8 sps:$4 sm:$0xff]  }
  0x10   :  { %526 = vmatpush1.bf16.msra.mxu1 %v1565_v15  ;;  %486 = vmatprep.subr.bf16.mxu0 %v1566_v16  ;;  %v1607_v43 = vld [vmem:[%s2740_s3 + $0x1d0] ss:$8 sps:$4 sm:$0xff]   ;;  %v1610_v45 = vld [vmem:[%s2740_s3 + $0x1c4] ss:$8 sps:$4 sm:$0xff]   ;;  %v1613_v48 = vld [vmem:[%s2740_s3 + $0x1c0] ss:$8 sps:$4 sm:$0xff]  }
  0x11   :  { %527 = vmatprep.subr.bf16.mxu1 %v1568_v17  ;;  %v23_v46 = vld [vmem:[%s2741_s1 + $0x8] sm:$0xff]  ;;  %v25_v50 = vld [vmem:[%s2741_s1 + $0x18] sm:$0xff]  ;;  %v22_v4 = vld [vmem:[%s2741_s1] sm:$0xff] }
  0x12   :  { %v91_v49 = vpack.c.bf16 %v23_v46, %v23_v46  ;;  %v1614_v51 = vld [vmem:[%s2740_s3 + $0xb4] ss:$8 sps:$4 sm:$0xff]   ;;  %v93_v52 = vpack.c.bf16 %v25_v50, %v25_v50  ;;  %v1618_v54 = vld [vmem:[%s2740_s3 + $0xb0] ss:$8 sps:$4 sm:$0xff]   ;;  %v1620_v56 = vld [vmem:[%s2740_s3 + $0xa4] ss:$8 sps:$4 sm:$0xff]   ;;  %v90_v8 = vpack.c.bf16 %v22_v4, %v22_v4 }
  0x13   :  { %487 = vmatpush1.bf16.msra.mxu0 %v1570_v18  ;;  %v1616_v53 = vld [vmem:[%s2740_s3 + $0x1b4] ss:$8 sps:$4 sm:$0xff]   ;;  %v1619_v55 = vld [vmem:[%s2740_s3 + $0x1b0] ss:$8 sps:$4 sm:$0xff]   ;;  %v1622_v57 = vld [vmem:[%s2740_s3 + $0x1a4] ss:$8 sps:$4 sm:$0xff]  }
  0x14   :  { %528 = vmatpush1.bf16.msra.mxu1 %v1571_v19  ;;  %488 = vmatprep.subr.bf16.mxu0 %v1572_v20  ;;  %v1624_v58 = vld [vmem:[%s2740_s3 + $0xa0] ss:$8 sps:$4 sm:$0xff]   ;;  %v1626_v60 = vld [vmem:[%s2740_s3 + $0x94] ss:$8 sps:$4 sm:$0xff]   ;;  %v1630_v62 = vld [vmem:[%s2740_s3 + $0x90] ss:$8 sps:$4 sm:$0xff]  }
  0x15   :  { %529 = vmatprep.subr.bf16.mxu1 %v1574_v21  ;;  %510 = vmatprep.mubr.bf16.mxu0 %v91_v49  ;;  %v1625_v59 = vld [vmem:[%s2740_s3 + $0x1a0] ss:$8 sps:$4 sm:$0xff]   ;;  %v1628_v61 = vld [vmem:[%s2740_s3 + $0x194] ss:$8 sps:$4 sm:$0xff]   ;;  %v1631_v63 = vld [vmem:[%s2740_s3 + $0x190] ss:$8 sps:$4 sm:$0xff]  }
  0x16   :  { %551 = vmatprep.mubr.bf16.mxu1 %v93_v52  ;;  %v1632_v0 = vld [vmem:[%s2740_s3 + $0x84] ss:$8 sps:$4 sm:$0xff]   ;;  %v1636_v2 = vld [vmem:[%s2740_s3 + $0x80] ss:$8 sps:$4 sm:$0xff]   ;;  %v24_v5 = vld [vmem:[%s2741_s1 + $0x10] sm:$0xff] }
  0x17   :  { %489 = vmatpush1.bf16.msra.mxu0 %v1576_v22  ;;  %v1634_v1 = vld [vmem:[%s2740_s3 + $0x184] ss:$8 sps:$4 sm:$0xff]   ;;  %v1637_v3 = vld [vmem:[%s2740_s3 + $0x180] ss:$8 sps:$4 sm:$0xff]   ;;  %v92_v9 = vpack.c.bf16 %v24_v5, %v24_v5 }
  0x18   :  { %530 = vmatpush1.bf16.msra.mxu1 %v1577_v23  ;;  %490 = vmatprep.subr.bf16.mxu0 %v1578_v24  ;;  %v1640_v6 = vld [vmem:[%s2742_s4 + $0xe4] ss:$16 sps:$4 sm:$0xff]   ;;  %v1643_v7 = vld [vmem:[%s2742_s4 + $0xec] ss:$16 sps:$4 sm:$0xff]   ;;  %v1638_v10 = vld [vmem:[%s2742_s4 + $0xe0] ss:$16 sps:$4 sm:$0xff]  }
  0x19   :  { %531 = vmatprep.subr.bf16.mxu1 %v1580_v25  ;;  %v1641_v11 = vld [vmem:[%s2742_s4 + $0xe8] ss:$16 sps:$4 sm:$0xff]   ;;  %v1646_v12 = vld [vmem:[%s2742_s4 + $0xc4] ss:$16 sps:$4 sm:$0xff]   ;;  %v1649_v13 = vld [vmem:[%s2742_s4 + $0xcc] ss:$16 sps:$4 sm:$0xff]  }
  0x1a   :  { %v1644_v14 = vld [vmem:[%s2742_s4 + $0xc0] ss:$16 sps:$4 sm:$0xff]   ;;  %v1647_v15 = vld [vmem:[%s2742_s4 + $0xc8] ss:$16 sps:$4 sm:$0xff]   ;;  %v1652_v16 = vld [vmem:[%s2742_s4 + $0xa4] ss:$16 sps:$4 sm:$0xff]  }
  0x1b   :  { %491 = vmatpush1.bf16.msra.mxu0 %v1582_v26  ;;  %v1655_v17 = vld [vmem:[%s2742_s4 + $0xac] ss:$16 sps:$4 sm:$0xff]   ;;  %v1650_v18 = vld [vmem:[%s2742_s4 + $0xa0] ss:$16 sps:$4 sm:$0xff]   ;;  %v1653_v19 = vld [vmem:[%s2742_s4 + $0xa8] ss:$16 sps:$4 sm:$0xff]  }
  0x1c   :  { %532 = vmatpush1.bf16.msra.mxu1 %v1583_v27  ;;  %492 = vmatprep.subr.bf16.mxu0 %v1584_v28  ;;  %v1658_v20 = vld [vmem:[%s2742_s4 + $0x84] ss:$16 sps:$4 sm:$0xff]   ;;  %v1661_v21 = vld [vmem:[%s2742_s4 + $0x8c] ss:$16 sps:$4 sm:$0xff]   ;;  %v1656_v22 = vld [vmem:[%s2742_s4 + $0x80] ss:$16 sps:$4 sm:$0xff]  }
  0x1d   :  { %533 = vmatprep.subr.bf16.mxu1 %v1586_v29  ;;  %v1659_v23 = vld [vmem:[%s2742_s4 + $0x88] ss:$16 sps:$4 sm:$0xff]   ;;  %v1664_v24 = vld [vmem:[%s2742_s4 + $0x64] ss:$16 sps:$4 sm:$0xff]   ;;  %v1667_v25 = vld [vmem:[%s2742_s4 + $0x6c] ss:$16 sps:$4 sm:$0xff]  }
  0x1e   :  { %v1662_v26 = vld [vmem:[%s2742_s4 + $0x60] ss:$16 sps:$4 sm:$0xff]   ;;  %v1665_v27 = vld [vmem:[%s2742_s4 + $0x68] ss:$16 sps:$4 sm:$0xff]   ;;  %v1670_v28 = vld [vmem:[%s2742_s4 + $0x44] ss:$16 sps:$4 sm:$0xff]  }
  0x1f   :  { %493 = vmatpush1.bf16.msra.mxu0 %v1588_v30  ;;  %v1673_v29 = vld [vmem:[%s2742_s4 + $0x4c] ss:$16 sps:$4 sm:$0xff]   ;;  %v1668_v30 = vld [vmem:[%s2742_s4 + $0x40] ss:$16 sps:$4 sm:$0xff]   ;;  %v1706_v52 = vld [vmem:[%s2742_s4 + $0x184] ss:$16 sps:$4 sm:$0xff]  }
  0x20   :  { %534 = vmatpush1.bf16.msra.mxu1 %v1589_v31  ;;  %494 = vmatprep.subr.bf16.mxu0 %v1590_v32  ;;  %v1671_v31 = vld [vmem:[%s2742_s4 + $0x48] ss:$16 sps:$4 sm:$0xff]   ;;  %v1676_v32 = vld [vmem:[%s2742_s4 + $0x24] ss:$16 sps:$4 sm:$0xff]   ;;  %v1692_v46 = vld [vmem:[%s2742_s4 + $0x1c0] ss:$16 sps:$4 sm:$0xff]  }
  0x21   :  { %535 = vmatprep.subr.bf16.mxu1 %v1592_v33  ;;  %v1679_v33 = vld [vmem:[%s2742_s4 + $0x2c] ss:$16 sps:$4 sm:$0xff]   ;;  %v1698_v50 = vld [vmem:[%s2742_s4 + $0x1a0] ss:$16 sps:$4 sm:$0xff]   ;;  %v1730_v4 = vld [vmem:[%s2742_s4 + $0x104] ss:$16 sps:$4 sm:$0xff]  }
  0x22   :  { %v1703_v49 = vld [vmem:[%s2742_s4 + $0x1ac] ss:$16 sps:$4 sm:$0xff]  }
  0x23   :  { %495 = vmatpush2.bf16.msra.mxu0 %v1594_v34  ;;  %v1674_v34 = vld [vmem:[%s2742_s4 + $0x20] ss:$16 sps:$4 sm:$0xff]   ;;  %v1733_v5 = vld [vmem:[%s2742_s4 + $0x10c] ss:$16 sps:$4 sm:$0xff]  }
  0x24   :  { %536 = vmatpush2.bf16.msra.mxu1 %v1595_v35  ;;  %496 = vmatprep.subr.bf16.mxu0 %v1596_v36  ;;  %v1677_v35 = vld [vmem:[%s2742_s4 + $0x28] ss:$16 sps:$4 sm:$0xff]   ;;  %v1682_v36 = vld [vmem:[%s2742_s4 + $0x4] ss:$16 sps:$4 sm:$0xff]  }
  0x25   :  { %537 = vmatprep.subr.bf16.mxu1 %v1598_v37  ;;  %v1685_v37 = vld [vmem:[%s2742_s4 + $0xc] ss:$16 sps:$4 sm:$0xff]  }
  0x27   :  { %497 = vmatpush2.bf16.msra.mxu0 %v1600_v38  ;;  %v1680_v38 = vld [vmem:[%s2742_s4] ss:$16 sps:$4 sm:$0xff]  }
  0x28   :  { %538 = vmatpush2.bf16.msra.mxu1 %v1601_v39  ;;  %498 = vmatprep.subr.bf16.mxu0 %v1602_v40  ;;  %v1683_v39 = vld [vmem:[%s2742_s4 + $0x8] ss:$16 sps:$4 sm:$0xff]   ;;  %v1688_v40 = vld [vmem:[%s2742_s4 + $0x1e4] ss:$16 sps:$4 sm:$0xff]  }
  0x29   :  { %539 = vmatprep.subr.bf16.mxu1 %v1604_v41  ;;  %v1691_v41 = vld [vmem:[%s2742_s4 + $0x1ec] ss:$16 sps:$4 sm:$0xff]  }
  0x2b   :  { %499 = vmatpush2.bf16.msra.mxu0 %v1606_v42  ;;  %v1686_v42 = vld [vmem:[%s2742_s4 + $0x1e0] ss:$16 sps:$4 sm:$0xff]  }
  0x2c   :  { %540 = vmatpush2.bf16.msra.mxu1 %v1607_v43  ;;  %500 = vmatprep.subr.bf16.mxu0 %v1608_v44  ;;  %v1689_v43 = vld [vmem:[%s2742_s4 + $0x1e8] ss:$16 sps:$4 sm:$0xff]   ;;  %v1694_v44 = vld [vmem:[%s2742_s4 + $0x1c4] ss:$16 sps:$4 sm:$0xff]  }
  0x2d   :  { %541 = vmatprep.subr.bf16.mxu1 %v1610_v45  ;;  %v1697_v45 = vld [vmem:[%s2742_s4 + $0x1cc] ss:$16 sps:$4 sm:$0xff]  }
  0x2f   :  { %501 = vmatpush2.bf16.msra.mxu0 %v1612_v47  ;;  %v1695_v47 = vld [vmem:[%s2742_s4 + $0x1c8] ss:$16 sps:$4 sm:$0xff]  }
  0x30   :  { %542 = vmatpush2.bf16.msra.mxu1 %v1613_v48  ;;  %502 = vmatprep.subr.bf16.mxu0 %v1614_v51  ;;  %v1700_v48 = vld [vmem:[%s2742_s4 + $0x1a4] ss:$16 sps:$4 sm:$0xff]   ;;  %v1701_v51 = vld [vmem:[%s2742_s4 + $0x1a8] ss:$16 sps:$4 sm:$0xff]  }
  0x31   :  { %543 = vmatprep.subr.bf16.mxu1 %v1616_v53  ;;  %v1709_v53 = vld [vmem:[%s2742_s4 + $0x18c] ss:$16 sps:$4 sm:$0xff]  }
  0x33   :  { %503 = vmatpush2.bf16.msra.mxu0 %v1618_v54  ;;  %v1704_v54 = vld [vmem:[%s2742_s4 + $0x180] ss:$16 sps:$4 sm:$0xff]  }
  0x34   :  { %544 = vmatpush2.bf16.msra.mxu1 %v1619_v55  ;;  %504 = vmatprep.subr.bf16.mxu0 %v1620_v56  ;;  %v1707_v55 = vld [vmem:[%s2742_s4 + $0x188] ss:$16 sps:$4 sm:$0xff]   ;;  %v1712_v56 = vld [vmem:[%s2742_s4 + $0x164] ss:$16 sps:$4 sm:$0xff]  }
  0x35   :  { %545 = vmatprep.subr.bf16.mxu1 %v1622_v57  ;;  %v1715_v57 = vld [vmem:[%s2742_s4 + $0x16c] ss:$16 sps:$4 sm:$0xff]  }
  0x37   :  { %505 = vmatpush2.bf16.msra.mxu0 %v1624_v58  ;;  %v1710_v58 = vld [vmem:[%s2742_s4 + $0x160] ss:$16 sps:$4 sm:$0xff]  }
  0x38   :  { %546 = vmatpush2.bf16.msra.mxu1 %v1625_v59  ;;  %506 = vmatprep.subr.bf16.mxu0 %v1626_v60  ;;  %v1713_v59 = vld [vmem:[%s2742_s4 + $0x168] ss:$16 sps:$4 sm:$0xff]   ;;  %v1718_v60 = vld [vmem:[%s2742_s4 + $0x144] ss:$16 sps:$4 sm:$0xff]  }
  0x39   :  { %547 = vmatprep.subr.bf16.mxu1 %v1628_v61  ;;  %v1721_v61 = vld [vmem:[%s2742_s4 + $0x14c] ss:$16 sps:$4 sm:$0xff]  }
  0x3b   :  { %507 = vmatpush2.bf16.msra.mxu0 %v1630_v62  ;;  %v1716_v62 = vld [vmem:[%s2742_s4 + $0x140] ss:$16 sps:$4 sm:$0xff]  }
  0x3c   :  { %548 = vmatpush2.bf16.msra.mxu1 %v1631_v63  ;;  %508 = vmatprep.subr.bf16.mxu0 %v1632_v0  ;;  %v1719_v63 = vld [vmem:[%s2742_s4 + $0x148] ss:$16 sps:$4 sm:$0xff]   ;;  %v1724_v0 = vld [vmem:[%s2742_s4 + $0x124] ss:$16 sps:$4 sm:$0xff]  }
  0x3d   :  { %549 = vmatprep.subr.bf16.mxu1 %v1634_v1  ;;  %v1727_v1 = vld [vmem:[%s2742_s4 + $0x12c] ss:$16 sps:$4 sm:$0xff]  }
  0x3f   :  { %509 = vmatpush2.bf16.msra.mxu0 %v1636_v2  ;;  %v1722_v2 = vld [vmem:[%s2742_s4 + $0x120] ss:$16 sps:$4 sm:$0xff]  }
  0x40   :  { %550 = vmatpush2.bf16.msra.mxu1 %v1637_v3  ;;  %948 = vmatprep.subr.bf16.mxu0 %v1640_v6  ;;  %v1725_v3 = vld [vmem:[%s2742_s4 + $0x128] ss:$16 sps:$4 sm:$0xff]   ;;  %v1728_v6 = vld [vmem:[%s2742_s4 + $0x100] ss:$16 sps:$4 sm:$0xff]  }
  0x41   :  { %989 = vmatprep.subr.bf16.mxu1 %v1643_v7  ;;  %v1731_v7 = vld [vmem:[%s2742_s4 + $0x108] ss:$16 sps:$4 sm:$0xff]  }
  0x42   :  { %511 = vmatmul.mubr.bf16.vlgmr.msra.gmra.mxu0 %v90_v8  ;;  %v2203_v8 = vld [vmem:[%s2743_s2 + $0x1c0] sm:$0xff] }
  0x43   :  { %552 = vmatmul.mubr.bf16.vlgmr.msra.gmra.mxu1 %v92_v9  ;;  %949 = vmatpush1.bf16.msra.mxu0 %v1638_v10  ;;  %v2208_v9 = vld [vmem:[%s2743_s2 + $0x1c8] sm:$0xff]  ;;  %v2213_v10 = vld [vmem:[%s2743_s2 + $0x1d0] sm:$0xff] }
  0x44   :  { %990 = vmatpush1.bf16.msra.mxu1 %v1641_v11  ;;  %950 = vmatprep.subr.bf16.mxu0 %v1646_v12  ;;  %v2218_v11 = vld [vmem:[%s2743_s2 + $0x1d8] sm:$0xff]  ;;  %v1119_v12 = vmul.f32 %v2203_v8, %v2203_v8 }
  0x45   :  { %991 = vmatprep.subr.bf16.mxu1 %v1649_v13  ;;  %v1120_v13 = vmul.f32 %v2208_v9, %v2208_v9 }
  0x47   :  { %951 = vmatpush1.bf16.msra.mxu0 %v1644_v14  ;;  %v1121_v14 = vmul.f32 %v2213_v10, %v2213_v10 }
  0x48   :  { %992 = vmatpush1.bf16.msra.mxu1 %v1647_v15  ;;  %952 = vmatprep.subr.bf16.mxu0 %v1652_v16  ;;  %v2229_v15 = vld [vmem:[%s2743_s2 + $0x1e0] sm:$0xff]  ;;  %v2234_v16 = vld [vmem:[%s2743_s2 + $0x1e8] sm:$0xff] }
  0x49   :  { %993 = vmatprep.subr.bf16.mxu1 %v1655_v17  ;;  %v2239_v17 = vld [vmem:[%s2743_s2 + $0x1f0] sm:$0xff] }
  0x4b   :  { %953 = vmatpush1.bf16.msra.mxu0 %v1650_v18  ;;  %v2244_v18 = vld [vmem:[%s2743_s2 + $0x1f8] sm:$0xff] }
  0x4c   :  { %994 = vmatpush1.bf16.msra.mxu1 %v1653_v19  ;;  %954 = vmatprep.subr.bf16.mxu0 %v1658_v20  ;;  %v1123_v19 = vmul.f32 %v2229_v15, %v2229_v15  ;;  %v1124_v20 = vmul.f32 %v2234_v16, %v2234_v16 }
  0x4d   :  { %995 = vmatprep.subr.bf16.mxu1 %v1661_v21  ;;  %v2253_v21 = vld [vmem:[%s2743_s2 + $0x180] sm:$0xff] }
  0x4f   :  { %955 = vmatpush1.bf16.msra.mxu0 %v1656_v22  ;;  %v1122_v22 = vmul.f32 %v2218_v11, %v2218_v11 }
  0x50   :  { %996 = vmatpush1.bf16.msra.mxu1 %v1659_v23  ;;  %956 = vmatprep.subr.bf16.mxu0 %v1664_v24  ;;  %v1197_v23 = vadd.f32 %v1120_v13, %v1119_v12  ;;  %v1125_v24 = vmul.f32 %v2239_v17, %v2239_v17  ;;  %v2394_v12 = vld [vmem:[%s2743_s2 + $0x138] sm:$0xff] }
  0x51   :  { %997 = vmatprep.subr.bf16.mxu1 %v1667_v25  ;;  %v2262_v25 = vld [vmem:[%s2743_s2 + $0x188] sm:$0xff] }
  0x53   :  { %957 = vmatpush1.bf16.msra.mxu0 %v1662_v26  ;;  %v2267_v26 = vld [vmem:[%s2743_s2 + $0x190] sm:$0xff] }
  0x54   :  { %998 = vmatpush1.bf16.msra.mxu1 %v1665_v27  ;;  %958 = vmatprep.subr.bf16.mxu0 %v1670_v28  ;;  %v2272_v27 = vld [vmem:[%s2743_s2 + $0x198] sm:$0xff]  ;;  %v1111_v28 = vmul.f32 %v2253_v21, %v2253_v21 }
  0x55   :  { %999 = vmatprep.subr.bf16.mxu1 %v1673_v29  ;;  %v1126_v29 = vmul.f32 %v2244_v18, %v2244_v18 }
  0x57   :  { %959 = vmatpush1.bf16.msra.mxu0 %v1668_v30  ;;  %v1202_v30 = vadd.f32 %v1124_v20, %v1123_v19  ;;  %v2403_v19 = vld [vmem:[%s2743_s2 + $0x110] sm:$0xff] }
  0x58   :  { %1000 = vmatpush1.bf16.msra.mxu1 %v1671_v31  ;;  %960 = vmatprep.subr.bf16.mxu0 %v1676_v32  ;;  %v1112_v31 = vmul.f32 %v2262_v25, %v2262_v25  ;;  %v1113_v32 = vmul.f32 %v2267_v26, %v2267_v26 }
  0x59   :  { %1001 = vmatprep.subr.bf16.mxu1 %v1679_v33  ;;  %v2285_v33 = vld [vmem:[%s2743_s2 + $0x1a0] sm:$0xff] }
  0x5b   :  { %961 = vmatpush1.bf16.msra.mxu0 %v1674_v34  ;;  %v2290_v34 = vld [vmem:[%s2743_s2 + $0x1a8] sm:$0xff] }
  0x5c   :  { %1002 = vmatpush1.bf16.msra.mxu1 %v1677_v35  ;;  %962 = vmatprep.subr.bf16.mxu0 %v1682_v36  ;;  %v2295_v35 = vld [vmem:[%s2743_s2 + $0x1b0] sm:$0xff]  ;;  %v1198_v36 = vadd.f32 %v1197_v23, %v1121_v14 }
  0x5d   :  { %1003 = vmatprep.subr.bf16.mxu1 %v1685_v37  ;;  %v2300_v37 = vld [vmem:[%s2743_s2 + $0x1b8] sm:$0xff] }
  0x5f   :  { %963 = vmatpush1.bf16.msra.mxu0 %v1680_v38  ;;  %v1115_v38 = vmul.f32 %v2285_v33, %v2285_v33 }
  0x60   :  { %1004 = vmatpush1.bf16.msra.mxu1 %v1683_v39  ;;  %964 = vmatprep.subr.bf16.mxu0 %v1688_v40  ;;  %v1116_v39 = vmul.f32 %v2290_v34, %v2290_v34  ;;  %v1117_v40 = vmul.f32 %v2295_v35, %v2295_v35 }
  0x61   :  { %1005 = vmatprep.subr.bf16.mxu1 %v1691_v41  ;;  %v2311_v41 = vld [vmem:[%s2743_s2 + $0x160] sm:$0xff] }
  0x63   :  { %965 = vmatpush2.bf16.msra.mxu0 %v1686_v42  ;;  %v2316_v42 = vld [vmem:[%s2743_s2 + $0x168] sm:$0xff] }
  0x64   :  { %1006 = vmatpush2.bf16.msra.mxu1 %v1689_v43  ;;  %966 = vmatprep.subr.bf16.mxu0 %v1694_v44  ;;  %v1203_v43 = vadd.f32 %v1202_v30, %v1125_v24  ;;  %v1114_v44 = vmul.f32 %v2272_v27, %v2272_v27  ;;  %v2422_v30 = vld [vmem:[%s2743_s2 + $0xe8] sm:$0xff] }
  0x65   :  { %1007 = vmatprep.subr.bf16.mxu1 %v1697_v45  ;;  %v1187_v45 = vadd.f32 %v1112_v31, %v1111_v28  ;;  %v2412_v28 = vld [vmem:[%s2743_s2 + $0x118] sm:$0xff] }
  0x67   :  { %967 = vmatpush2.bf16.msra.mxu0 %v1692_v46  ;;  %v2323_v46 = vld [vmem:[%s2743_s2 + $0x170] sm:$0xff] }
  0x68   :  { %1008 = vmatpush2.bf16.msra.mxu1 %v1695_v47  ;;  %968 = vmatprep.subr.bf16.mxu0 %v1700_v48  ;;  %v2328_v47 = vld [vmem:[%s2743_s2 + $0x178] sm:$0xff]  ;;  %v1107_v48 = vmul.f32 %v2311_v41, %v2311_v41 }
  0x69   :  { %1009 = vmatprep.subr.bf16.mxu1 %v1703_v49  ;;  %v2335_v49 = vld [vmem:[%s2743_s2 + $0x140] sm:$0xff] }
  0x6b   :  { %969 = vmatpush2.bf16.msra.mxu0 %v1698_v50  ;;  %v1199_v50 = vadd.f32 %v1198_v36, %v1122_v22 }
  0x6c   :  { %1010 = vmatpush2.bf16.msra.mxu1 %v1701_v51  ;;  %970 = vmatprep.subr.bf16.mxu0 %v1706_v52  ;;  %v1118_v51 = vmul.f32 %v2300_v37, %v2300_v37  ;;  %v1192_v52 = vadd.f32 %v1116_v39, %v1115_v38  ;;  %v2431_v39 = vld [vmem:[%s2743_s2 + $0xf0] sm:$0xff] }
  0x6d   :  { %1011 = vmatprep.subr.bf16.mxu1 %v1709_v53  ;;  %v1108_v53 = vmul.f32 %v2316_v42, %v2316_v42  ;;  %1200 = vadd.xlane.f32.xlu0 %v1199_v50  ;;  %2764 = vst [vmem:[#allocation3_spill] sm:$0xff] %v2431_v39  ;;  %v1098_v50 = vmul.f32 %v2412_v28, %v2412_v28 }
  0x6f   :  { %971 = vmatpush2.bf16.msra.mxu0 %v1704_v54  ;;  %v2344_v54 = vld [vmem:[%s2743_s2 + $0x148] sm:$0xff] }
  0x70   :  { %1012 = vmatpush2.bf16.msra.mxu1 %v1707_v55  ;;  %972 = vmatprep.subr.bf16.mxu0 %v1712_v56  ;;  %v2349_v55 = vld [vmem:[%s2743_s2 + $0x150] sm:$0xff]  ;;  %v2354_v56 = vld [vmem:[%s2743_s2 + $0x158] sm:$0xff] }
  0x71   :  { %1013 = vmatprep.subr.bf16.mxu1 %v1715_v57  ;;  %v1204_v57 = vadd.f32 %v1203_v43, %v1126_v29  ;;  %v1106_v22 = vmul.f32 %v2354_v56, %v2354_v56  ;;  %v2417_v29 = vld [vmem:[%s2743_s2 + $0xe0] sm:$0xff] }
  0x73   :  { %973 = vmatpush2.bf16.msra.mxu0 %v1710_v58  ;;  %v1188_v58 = vadd.f32 %v1187_v45, %v1113_v32  ;;  %1205 = vadd.xlane.f32.xlu0 %v1204_v57  ;;  %v1097_v45 = vmul.f32 %v2403_v19, %v2403_v19  ;;  %v2456_v57 = vld [vmem:[%s2743_s2 + $0xd0] sm:$0xff] }
  0x74   :  { %1014 = vmatpush2.bf16.msra.mxu1 %v1713_v59  ;;  %974 = vmatprep.subr.bf16.mxu0 %v1718_v60  ;;  %v1109_v59 = vmul.f32 %v2323_v46, %v2323_v46  ;;  %v1103_v60 = vmul.f32 %v2335_v49, %v2335_v49  ;;  %2765 = vst [vmem:[#allocation4_spill] sm:$0xff] %v2456_v57 }
  0x75   :  { %1015 = vmatprep.subr.bf16.mxu1 %v1721_v61  ;;  %v2363_v61 = vld [vmem:[%s2743_s2 + $0x120] sm:$0xff] }
  0x76   :  { %v1099_v13 = vmul.f32 %v2363_v61, %v2363_v61 }
  0x77   :  { %975 = vmatpush2.bf16.msra.mxu0 %v1716_v62  ;;  %v2368_v62 = vld [vmem:[%s2743_s2 + $0x128] sm:$0xff] }
  0x78   :  { %1016 = vmatpush2.bf16.msra.mxu1 %v1719_v63  ;;  %976 = vmatprep.subr.bf16.mxu0 %v1724_v0  ;;  %v2373_v63 = vld [vmem:[%s2743_s2 + $0x130] sm:$0xff]  ;;  %v1193_v0 = vadd.f32 %v1192_v52, %v1117_v40  ;;  %v1100_v14 = vmul.f32 %v2368_v62, %v2368_v62  ;;  %v2436_v40 = vld [vmem:[%s2743_s2 + $0xc0] sm:$0xff]  ;;  %v1091_v52 = vmul.f32 %v2417_v29, %v2417_v29 }
  0x79   :  { %1017 = vmatprep.subr.bf16.mxu1 %v1727_v1  ;;  %v1182_v1 = vadd.f32 %v1108_v53, %v1107_v48  ;;  %v1101_v24 = vmul.f32 %v2373_v63, %v2373_v63  ;;  %v2445_v48 = vld [vmem:[%s2743_s2 + $0xc8] sm:$0xff]  ;;  %v1092_v53 = vmul.f32 %v2422_v30, %v2422_v30 }
  0x7a   :  { %v1194_v20 = vadd.f32 %v1193_v0, %v1118_v51  ;;  %v1172_v32 = vadd.f32 %v1100_v14, %v1099_v13 }
  0x7b   :  { %977 = vmatpush2.bf16.msra.mxu0 %v1722_v2  ;;  %v1104_v2 = vmul.f32 %v2344_v54, %v2344_v54  ;;  %v1183_v31 = vadd.f32 %v1182_v1, %v1109_v59  ;;  %v2466_v59 = vld [vmem:[%s2743_s2 + $0xa8] sm:$0xff]  ;;  %v2471_v1 = vld [vmem:[%s2743_s2 + $0xf8] sm:$0xff] }
  0x7c   :  { %1018 = vmatpush2.bf16.msra.mxu1 %v1725_v3  ;;  %978 = vmatprep.subr.bf16.mxu0 %v1730_v4  ;;  %v1105_v3 = vmul.f32 %v2349_v55, %v2349_v55  ;;  %v2382_v4 = vld [vmem:[%s2743_s2 + $0x100] sm:$0xff]  ;;  %2767 = vst [vmem:[#allocation6_spill] sm:$0xff] %v2466_v59  ;;  %v1173_v0 = vadd.f32 %v1172_v32, %v1101_v24  ;;  %v2492_v32 = vld [vmem:[%s2743_s2 + $0x88] sm:$0xff] }
  0x7d   :  { %1019 = vmatprep.subr.bf16.mxu1 %v1733_v5  ;;  %v2387_v5 = vld [vmem:[%s2743_s2 + $0x108] sm:$0xff]  ;;  %v1177_v23 = vadd.f32 %v1104_v2, %v1103_v60  ;;  %v1095_v36 = vmul.f32 %v2382_v4, %v2382_v4  ;;  %v1093_v2 = vmul.f32 %v2431_v39, %v2431_v39  ;;  %v2487_v24 = vld [vmem:[%s2743_s2 + $0x80] sm:$0xff] }
  0x7e   :  { %v1096_v38 = vmul.f32 %v2387_v5, %v2387_v5  ;;  %2768 = vst [vmem:[#allocation7_spill] sm:$0xff] %v2487_v24 }
  0x7f   :  { %979 = vmatpush2.bf16.msra.mxu0 %v1728_v6  ;;  %v1189_v6 = vadd.f32 %v1188_v58, %v1114_v44  ;;  %v1178_v43 = vadd.f32 %v1177_v23, %v1105_v3  ;;  %v1102_v44 = vmul.f32 %v2394_v12, %v2394_v12  ;;  %v2461_v58 = vld [vmem:[%s2743_s2 + $0xa0] sm:$0xff]  ;;  %v2478_v3 = vld [vmem:[%s2743_s2 + $0xd8] sm:$0xff]  ;;  %v1088_v23 = vmul.f32 %v2445_v48, %v2445_v48 }
  0x80   :  { %1020 = vmatpush2.bf16.msra.mxu1 %v1731_v7  ;;  %v1110_v7 = vmul.f32 %v2328_v47, %v2328_v47  ;;  %v1167_v51 = vadd.f32 %v1096_v38, %v1095_v36  ;;  %2766 = vst [vmem:[#allocation5_spill] sm:$0xff] %v2461_v58  ;;  %v1084_v36 = vmul.f32 %v2466_v59, %v2466_v59  ;;  %v2508_v38 = vld [vmem:[%s2743_s2 + $0x90] sm:$0xff] }
  0x81   :  { %1190 = vadd.xlane.f32.xlu1 %v1189_v6  ;;  %v1179_v60 = vadd.f32 %v1178_v43, %v1106_v22  ;;  %v1087_v6 = vmul.f32 %v2436_v40, %v2436_v40  ;;  %v1162_v22 = vadd.f32 %v1092_v53, %v1091_v52  ;;  %2770 = vst [vmem:[#allocation9_spill] sm:$0xff] %v2508_v38  ;;  %v2517_v53 = vld [vmem:[%s2743_s2 + $0x98] sm:$0xff] }
  0x82   :  { %v1184_v13 = vadd.f32 %v1183_v31, %v1110_v7  ;;  %v1168_v14 = vadd.f32 %v1167_v51, %v1097_v45  ;;  %v2499_v7 = vld [vmem:[%s2743_s2 + $0xb0] sm:$0xff]  ;;  %v1083_v31 = vmul.f32 %v2461_v58, %v2461_v58  ;;  %v1094_v45 = vmul.f32 %v2471_v1, %v2471_v1  ;;  %2771 = vst [vmem:[#allocation10_spill] sm:$0xff] %v2517_v53 }
  0x83   :  { %1180 = vadd.xlane.f32.xlu0 %v1179_v60  ;;  %2769 = vst [vmem:[#allocation8_spill] sm:$0xff] %v2499_v7  ;;  %v1090_v51 = vmul.f32 %v2478_v3, %v2478_v3  ;;  %v1157_v52 = vadd.f32 %v1088_v23, %v1087_v6  ;;  %v1174_v60 = vadd.f32 %v1173_v0, %v1102_v44  ;;  %v2530_v44 = vld [vmem:[%s2743_s2 + $0xb8] sm:$0xff] }
  0x84   :  { %v1169_v43 = vadd.f32 %v1168_v14, %v1098_v50  ;;  %v1163_v58 = vadd.f32 %v1162_v22, %v1093_v2  ;;  %v1079_v59 = vmul.f32 %v2487_v24, %v2487_v24  ;;  %v1080_v50 = vmul.f32 %v2492_v32, %v2492_v32 }
  0x85   :  { %1195 = vadd.xlane.f32.xlu1 %v1194_v20  ;;  %v1089_v20 = vmul.f32 %v2456_v57, %v2456_v57  ;;  %v1085_v39 = vmul.f32 %v2499_v7, %v2499_v7  ;;  %v1152_v57 = vadd.f32 %v1084_v36, %v1083_v31  ;;  %v1081_v6 = vmul.f32 %v2508_v38, %v2508_v38 }
  0x86   :  { %v1082_v0 = vmul.f32 %v2517_v53, %v2517_v53  ;;  %v1147_v2 = vadd.f32 %v1080_v50, %v1079_v59  ;;  %v1164_v23 = vadd.f32 %v1163_v58, %v1094_v45 }
  0x87   :  { %v1158_v14 = vadd.f32 %v1157_v52, %v1089_v20  ;;  %1170 = vadd.xlane.f32.xlu0 %v1169_v43  ;;  %v1086_v20 = vmul.f32 %v2530_v44, %v2530_v44  ;;  %v1153_v31 = vadd.f32 %v1152_v57, %v1085_v39  ;;  %v2539_v57 = vld [vmem:[%s2743_s2 + $0x60] sm:$0xff] }
  0x89   :  { %1185 = vadd.xlane.f32.xlu1 %v1184_v13  ;;  %v1159_v22 = vadd.f32 %v1158_v14, %v1090_v51  ;;  %v1148_v13 = vadd.f32 %v1147_v2, %v1081_v6  ;;  %v1154_v43 = vadd.f32 %v1153_v31, %v1086_v20 }
  0x8b   :  { %1160 = vadd.xlane.f32.xlu0 %v1159_v22  ;;  %v1149_v36 = vadd.f32 %v1148_v13, %v1082_v0  ;;  %v2558_v0 = vld [vmem:[%s2743_s2 + $0x48] sm:$0xff]  ;;  %v2565_v22 = vld [vmem:[%s2743_s2 + $0x70] sm:$0xff] }
  0x8c   :  { %v2570_v13 = vld [vmem:[%s2743_s2 + $0x50] sm:$0xff]  ;;  %v1077_v20 = vmul.f32 %v2565_v22, %v2565_v22 }
  0x8d   :  { %1175 = vadd.xlane.f32.xlu1 %v1174_v60  ;;  %2773 = vst [vmem:[#allocation12_spill] sm:$0xff] %v2570_v13 }
  0x8f   :  { %1150 = vadd.xlane.f32.xlu0 %v1149_v36  ;;  %v1073_v36 = vmul.f32 %v2570_v13, %v2570_v13  ;;  %v1047_v13 = vstv %s2744_s0 }
  0x91   :  { %1165 = vadd.xlane.f32.xlu1 %v1164_v23  ;;  %v1072_v23 = vmul.f32 %v2558_v0, %v2558_v0 }
  0x95   :  { %1155 = vadd.xlane.f32.xlu1 %v1154_v43  ;;  %v2581_v43 = vld [vmem:[%s2743_s2 + $0x78] sm:$0xff] }
 0x102   :  { %v512_v52 = vpop.f32.mrf.mxu0 }
 0x103   :  { %v553_v7 = vpop.f32.mrf.mxu1 }
 0x104   :  { %v554_v38 = vadd.f32 %v553_v7, %v512_v52  ;;  %v514_v24 = vpop.f32.mrf.mxu0  ;;  %v2549_v7 = vld [vmem:[%s2743_s2 + $0x40] sm:$0xff]  ;;  %v2586_v52 = vld [vmem:[%s2743_s2 + $0x58] sm:$0xff] }
 0x105   :  { %v555_v53 = vpop.f32.mrf.mxu1  ;;  %2772 = vst [vmem:[#allocation11_spill] sm:$0xff] %v2549_v7  ;;  %v1071_v2 = vmul.f32 %v2549_v7, %v2549_v7 }
 0x106   :  { %v556_v59 = vadd.f32 %v555_v53, %v514_v24  ;;  %v560_v51 = vmax.f32 %v554_v38, 0.0  ;;  %v516_v50 = vpop.f32.mrf.mxu0  ;;  %v2544_v24 = vld [vmem:[%s2743_s2 + $0x68] sm:$0xff]  ;;  %v1075_v38 = vmul.f32 %v2539_v57, %v2539_v57 }
 0x107   :  { %v557_v60 = vpop.f32.mrf.mxu1  ;;  %v1076_v53 = vmul.f32 %v2544_v24, %v2544_v24 }
 0x108   :  { %v561_v58 = vmax.f32 %v556_v59, 0.0  ;;  %v517_v45 = vpop.f32.mrf.mxu0  ;;  %v562_v39 = vpack.c.bf16 %v560_v51, %v560_v51  ;;  %v1137_v59 = vadd.f32 %v1072_v23, %v1071_v2  ;;  %v1078_v51 = vmul.f32 %v2581_v43, %v2581_v43  ;;  %v2614_v23 = vld [vmem:[%s2743_s2 + $0x8] sm:$0xff] }
 0x109   :  { %v558_v14 = vpop.f32.mrf.mxu1  ;;  %v1142_v31 = vadd.f32 %v1076_v53, %v1075_v38  ;;  %v1074_v60 = vmul.f32 %v2586_v52, %v2586_v52  ;;  %v2605_v38 = vld [vmem:[%s2743_s2] sm:$0xff]  ;;  %2777 = vst [vmem:[#allocation16_spill] sm:$0xff] %v2614_v23 }
 0x10a   :  { %v563_v6 = vpack.c.bf16 %v561_v58, %v561_v58  ;;  %v1138_v58 = vadd.f32 %v1137_v59, %v1073_v36  ;;  %2776 = vst [vmem:[#allocation15_spill] sm:$0xff] %v2605_v38  ;;  %v1063_v36 = vmul.f32 %v2605_v38, %v2605_v38  ;;  %v1064_v59 = vmul.f32 %v2614_v23, %v2614_v23  ;;  %v1201_v23 = vpop.xlane.xlu0 %1200 }
 0x10b   :  { %v1143_v50 = vadd.f32 %v1142_v31, %v1077_v20  ;;  %v2619_v20 = vld [vmem:[%s2743_s2 + $0x30] sm:$0xff]  ;;  %1734 = vrsqrt.f32 %v1201_v23 }
 0x10c   :  { %980 = vmatprep.mubr.bf16.mxu0 %v563_v6  ;;  %1021 = vmatprep.mubr.bf16.mxu1 %v563_v6  ;;  %v1139_v14 = vadd.f32 %v1138_v58, %v1074_v60  ;;  %v2595_v6 = vld [vmem:[%s2743_s2 + $0x20] sm:$0xff]  ;;  %2778 = vst [vmem:[#allocation17_spill] sm:$0xff] %v2619_v20  ;;  %v2624_v31 = vld [vmem:[%s2743_s2 + $0x10] sm:$0xff]  ;;  %v2637_v58 = vld [vmem:[%s2743_s2 + $0x38] sm:$0xff] }
 0x10d   :  { %981 = vmatmul.mubr.bf16.vlgmr.msra.gmra.mxu0 %v562_v39  ;;  %1022 = vmatmul.mubr.bf16.vlgmr.msra.gmra.mxu1 %v562_v39  ;;  %v1144_v45 = vadd.f32 %v1143_v50, %v1078_v51  ;;  %2774 = vst [vmem:[#allocation13_spill] sm:$0xff] %v2595_v6  ;;  %v2600_v39 = vld [vmem:[%s2743_s2 + $0x28] sm:$0xff]  ;;  %v1067_v53 = vmul.f32 %v2595_v6, %v2595_v6  ;;  %2779 = vst [vmem:[#allocation18_spill] sm:$0xff] %v2624_v31 }
 0x10e   :  { %2775 = vst [vmem:[#allocation14_spill] sm:$0xff] %v2600_v39  ;;  %v1068_v2 = vmul.f32 %v2600_v39, %v2600_v39  ;;  %1140 = vadd.xlane.f32.xlu0 %v1139_v14  ;;  %v1069_v51 = vmul.f32 %v2619_v20, %v2619_v20  ;;  %v1065_v60 = vmul.f32 %v2624_v31, %v2624_v31  ;;  %2780 = vst [vmem:[#allocation19_spill] sm:$0xff] %v2637_v58  ;;  %v1191_v39 = vpop.xlane.xlu1 %1190 }
 0x10f   :  { %1145 = vadd.xlane.f32.xlu1 %v1144_v45  ;;  %v2642_v45 = vld [vmem:[%s2743_s2 + $0x18] sm:$0xff]  ;;  %v1127_v14 = vadd.f32 %v1064_v59, %v1063_v36  ;;  %v1070_v6 = vmul.f32 %v2637_v58, %v2637_v58  ;;  %1736 = vrsqrt.f32 %v1191_v39  ;;  %v1048_v36 = vmul.f32 1.442695, %v1047_v13  ;;  %v1206_v59 = vpop.xlane.xlu0 %1205 }
 0x110   :  { %v1132_v50 = vadd.f32 %v1068_v2, %v1067_v53  ;;  %2781 = vst [vmem:[#allocation20_spill] sm:$0xff] %v2642_v45  ;;  %v1066_v53 = vmul.f32 %v2642_v45, %v2642_v45 }
 0x111   :  { %v1128_v2 = vadd.f32 %v1127_v14, %v1065_v60  ;;  %1738 = vpow2.f32 %v1048_v36 }
 0x112   :  { %v1133_v38 = vadd.f32 %v1132_v50, %v1069_v51  ;;  %v1196_v58 = vpop.xlane.xlu1 %1195  ;;  %1740 = vrsqrt.f32 %v1206_v59 }
 0x113   :  { %v1129_v31 = vadd.f32 %v1128_v2, %v1066_v53  ;;  %1742 = vrsqrt.f32 %v1196_v58  ;;  %v1181_v50 = vpop.xlane.xlu0 %1180 }
 0x114   :  { %v1134_v20 = vadd.f32 %v1133_v38, %v1070_v6 }
 0x115   :  { %1130 = vadd.xlane.f32.xlu0 %v1129_v31 }
 0x116   :  { %1135 = vadd.xlane.f32.xlu1 %v1134_v20  ;;  %v1186_v51 = vpop.xlane.xlu1 %1185 }
 0x117   :  { %1744 = vrsqrt.f32 %v1186_v51  ;;  %v1171_v38 = vpop.xlane.xlu0 %1170 }
 0x118   :  { %1746 = vrsqrt.f32 %v1181_v50  ;;  %v1735_v20 = vpop.eup %1734 }
 0x119   :  { %v1288_v60 = vmul.f32 %v1735_v20, %v2208_v9  ;;  %v1290_v13 = vmul.f32 %v1735_v20, %v2218_v11  ;;  %v1287_v39 = vmul.f32 %v1735_v20, %v2203_v8  ;;  %v1289_v14 = vmul.f32 %v1735_v20, %v2213_v10 }
 0x11a   :  { %v1176_v6 = vpop.xlane.xlu1 %1175 }
 0x11b   :  { %1748 = vrsqrt.f32 %v1176_v6  ;;  %v1161_v7 = vpop.xlane.xlu0 %1160 }
 0x11c   :  { %v1737_v31 = vpop.eup %1736  ;;  %1750 = vrsqrt.f32 %v1171_v38 }
 0x11d   :  { %v1280_v53 = vmul.f32 %v1737_v31, %v2262_v25  ;;  %v1282_v2 = vmul.f32 %v1737_v31, %v2272_v27 }
 0x11e   :  { %v1739_v23 = vpop.eup %1738  ;;  %v1166_v20 = vpop.xlane.xlu1 %1165 }
 0x11f   :  { %v1741_v58 = vpop.eup %1740  ;;  %1540 = vpush %v1739_v23  ;;  %1752 = vrsqrt.f32 %v1166_v20 }
 0x120   :  { %v1743_v36 = vpop.eup %1742  ;;  %v1292_v59 = vmul.f32 %v1741_v58, %v2234_v16  ;;  %v1294_v51 = vmul.f32 %v1741_v58, %v2244_v18  ;;  %v1291_v50 = vmul.f32 %v1741_v58, %v2229_v15  ;;  %v1293_v9 = vmul.f32 %v1741_v58, %v2239_v17 }
 0x121   :  { %v1284_v11 = vmul.f32 %v1743_v36, %v2290_v34  ;;  %v1286_v8 = vmul.f32 %v1743_v36, %v2300_v37  ;;  %v1279_v15 = vmul.f32 %v1737_v31, %v2253_v21  ;;  %v1281_v17 = vmul.f32 %v1737_v31, %v2267_v26 }
 0x122   :  { %v1324_v10 = vpack.c.bf16 %v1292_v59, %v1288_v60  ;;  %v1326_v6 = vpack.c.bf16 %v1294_v51, %v1290_v13  ;;  %v1323_v38 = vpack.c.bf16 %v1291_v50, %v1287_v39  ;;  %v1325_v25 = vpack.c.bf16 %v1293_v9, %v1289_v14 }
 0x123   :  { %v1320_v23 = vpack.c.bf16 %v1284_v11, %v1280_v53  ;;  %v1322_v45 = vpack.c.bf16 %v1286_v8, %v1282_v2  ;;  %v1283_v18 = vmul.f32 %v1743_v36, %v2285_v33  ;;  %v1285_v34 = vmul.f32 %v1743_v36, %v2295_v35  ;;  %v1156_v53 = vpop.xlane.xlu1 %1155  ;;  %v1151_v35 = vpop.xlane.xlu0 %1150 }
 0x124   :  { %v1745_v27 = vpop.eup %1744  ;;  %1327 = vmatprep.subr.bf16.mxu0 %v1324_v10  ;;  %1367 = vmatprep.subr.bf16.mxu1 %v1326_v6  ;;  %1754 = vrsqrt.f32 %v1161_v7 }
 0x125   :  { %v1747_v16 = vpop.eup %1746  ;;  %1328 = vmatpush1.bf16.xpose.msra.mxu0 %v1323_v38  ;;  %1368 = vmatpush1.bf16.xpose.msra.mxu1 %v1325_v25  ;;  %v1276_v37 = vmul.f32 %v1745_v27, %v2316_v42  ;;  %v1278_v21 = vmul.f32 %v1745_v27, %v2328_v47  ;;  %v1319_v26 = vpack.c.bf16 %v1283_v18, %v1279_v15  ;;  %1756 = vrsqrt.f32 %v1156_v53 }
 0x126   :  { %1329 = vmatprep.subr.bf16.mxu0 %v1320_v23  ;;  %1369 = vmatprep.subr.bf16.mxu1 %v1322_v45  ;;  %v1272_v60 = vmul.f32 %v1747_v16, %v2344_v54  ;;  %v1274_v13 = vmul.f32 %v1747_v16, %v2354_v56  ;;  %v1321_v31 = vpack.c.bf16 %v1285_v34, %v1281_v17  ;;  %1758 = vrsqrt.f32 %v1151_v35  ;;  %v2784_v23 = vld [vmem:[#allocation6_spill] sm:$0xff]  ;;  %v1770_v35 = vld [vmem:[%s2741_s1] sm:$0xff] }
 0x127   :  { %v1271_v2 = vmul.f32 %v1747_v16, %v2335_v49  ;;  %v1275_v42 = vmul.f32 %v1745_v27, %v2311_v41  ;;  %v1273_v54 = vmul.f32 %v1747_v16, %v2349_v55  ;;  %v1277_v56 = vmul.f32 %v1745_v27, %v2323_v46  ;;  %v2783_v27 = vld [vmem:[#allocation3_spill] sm:$0xff]  ;;  %v2785_v16 = vld [vmem:[#allocation10_spill] sm:$0xff] }
 0x128   :  { %v1749_v39 = vpop.eup %1748  ;;  %v1316_v58 = vpack.c.bf16 %v1276_v37, %v1272_v60  ;;  %v1318_v33 = vpack.c.bf16 %v1278_v21, %v1274_v13  ;;  %v2786_v37 = vld [vmem:[#allocation5_spill] sm:$0xff]  ;;  %v2787_v13 = vld [vmem:[#allocation7_spill] sm:$0xff] }
 0x129   :  { %v1751_v14 = vpop.eup %1750  ;;  %v1268_v47 = vmul.f32 %v1749_v39, %v2368_v62  ;;  %v1270_v49 = vmul.f32 %v1749_v39, %v2394_v12  ;;  %v1315_v36 = vpack.c.bf16 %v1275_v42, %v1271_v2  ;;  %v1317_v41 = vpack.c.bf16 %v1277_v56, %v1273_v54  ;;  %v1771_v54 = vld [vmem:[%s2741_s1 + $0x8] sm:$0xff] }
 0x12a   :  { %v1264_v7 = vmul.f32 %v1751_v14, %v2387_v5  ;;  %v1266_v45 = vmul.f32 %v1751_v14, %v2412_v28  ;;  %v1263_v46 = vmul.f32 %v1751_v14, %v2382_v4  ;;  %v1267_v9 = vmul.f32 %v1749_v39, %v2363_v61 }
 0x12b   :  { %v1265_v62 = vmul.f32 %v1751_v14, %v2403_v19  ;;  %v1269_v5 = vmul.f32 %v1749_v39, %v2373_v63  ;;  %v2788_v39 = vld [vmem:[#allocation9_spill] sm:$0xff]  ;;  %v1038_v2 = vmul.f32 0.2, %v1770_v35  ;;  %v1039_v56 = vmul.f32 0.2, %v1771_v54 }
 0x12c   :  { %v1753_v59 = vpop.eup %1752  ;;  %v1312_v51 = vpack.c.bf16 %v1268_v47, %v1264_v7  ;;  %v1314_v50 = vpack.c.bf16 %v1270_v49, %v1266_v45  ;;  %v1311_v10 = vpack.c.bf16 %v1267_v9, %v1263_v46  ;;  %v1772_v47 = vld [vmem:[%s2741_s1 + $0x10] sm:$0xff]  ;;  %v1773_v46 = vld [vmem:[%s2741_s1 + $0x18] sm:$0xff] }
 0x12d   :  { %1330 = vmatpush1.bf16.xpose.msra.mxu0 %v1319_v26  ;;  %1370 = vmatpush1.bf16.xpose.msra.mxu1 %v1321_v31  ;;  %v1260_v28 = vmul.f32 %v1753_v59, %v2422_v30  ;;  %v1262_v8 = vmul.f32 %v1753_v59, %v2471_v1  ;;  %v1313_v4 = vpack.c.bf16 %v1269_v5, %v1265_v62  ;;  %v2782_v30 = vld [vmem:[#allocation4_spill] sm:$0xff]  ;;  %v1040_v7 = vmul.f32 0.2, %v1772_v47  ;;  %v2797_v35 = vld [vmem:[#allocation13_spill] sm:$0xff] }
 0x12e   :  { %1331 = vmatprep.subr.bf16.mxu0 %v1316_v58  ;;  %1371 = vmatprep.subr.bf16.mxu1 %v1318_v33  ;;  %v1259_v63 = vmul.f32 %v1753_v59, %v2417_v29  ;;  %v2789_v31 = vld [vmem:[#allocation8_spill] sm:$0xff]  ;;  %v1041_v9 = vmul.f32 0.2, %v1773_v46 }
 0x131   :  { %v1755_v55 = vpop.eup %1754 }
 0x132   :  { %v1256_v12 = vmul.f32 %v1755_v55, %v2445_v48  ;;  %v1258_v11 = vmul.f32 %v1755_v55, %v2478_v3  ;;  %v1757_v6 = vpop.eup %1756  ;;  %v1255_v19 = vmul.f32 %v1755_v55, %v2436_v40  ;;  %v1257_v20 = vmul.f32 %v1755_v55, %v2782_v30 }
 0x133   :  { %v1759_v25 = vpop.eup %1758  ;;  %v1261_v48 = vmul.f32 %v1753_v59, %v2783_v27  ;;  %v1252_v3 = vmul.f32 %v1757_v6, %v2784_v23  ;;  %v1254_v17 = vmul.f32 %v1757_v6, %v2530_v44  ;;  %v1251_v60 = vmul.f32 %v1757_v6, %v2786_v37 }
 0x134   :  { %v1308_v61 = vpack.c.bf16 %v1260_v28, %v1256_v12  ;;  %v1310_v38 = vpack.c.bf16 %v1262_v8, %v1258_v11  ;;  %v1248_v1 = vmul.f32 %v1759_v25, %v2492_v32  ;;  %v1250_v15 = vmul.f32 %v1759_v25, %v2785_v16 }
 0x135   :  { %1332 = vmatpush1.bf16.xpose.msra.mxu0 %v1315_v36  ;;  %1372 = vmatpush1.bf16.xpose.msra.mxu1 %v1317_v41  ;;  %v1307_v18 = vpack.c.bf16 %v1259_v63, %v1255_v19  ;;  %v1309_v40 = vpack.c.bf16 %v1261_v48, %v1257_v20  ;;  %v1247_v21 = vmul.f32 %v1759_v25, %v2787_v13 }
 0x136   :  { %1333 = vmatprep.subr.bf16.mxu0 %v1312_v51  ;;  %1373 = vmatprep.subr.bf16.mxu1 %v1314_v50  ;;  %v1304_v34 = vpack.c.bf16 %v1252_v3, %v1248_v1  ;;  %v1306_v29 = vpack.c.bf16 %v1254_v17, %v1250_v15  ;;  %v1249_v26 = vmul.f32 %v1759_v25, %v2788_v39 }
 0x137   :  { %v1253_v14 = vmul.f32 %v1757_v6, %v2789_v31  ;;  %v1303_v32 = vpack.c.bf16 %v1251_v60, %v1247_v21  ;;  %v2791_v60 = vld [vmem:[#allocation12_spill] sm:$0xff] }
 0x139   :  { %v1305_v58 = vpack.c.bf16 %v1253_v14, %v1249_v26  ;;  %v2793_v14 = vld [vmem:[#allocation19_spill] sm:$0xff] }
 0x13d   :  { %1334 = vmatpush1.bf16.xpose.msra.mxu0 %v1311_v10  ;;  %1374 = vmatpush1.bf16.xpose.msra.mxu1 %v1313_v4 }
 0x13e   :  { %1335 = vmatprep.subr.bf16.mxu0 %v1308_v61  ;;  %1375 = vmatprep.subr.bf16.mxu1 %v1310_v38 }
 0x145   :  { %1336 = vmatpush1.bf16.xpose.msra.mxu0 %v1307_v18  ;;  %1376 = vmatpush1.bf16.xpose.msra.mxu1 %v1309_v40 }
 0x146   :  { %1337 = vmatprep.subr.bf16.mxu0 %v1304_v34  ;;  %1377 = vmatprep.subr.bf16.mxu1 %v1306_v29  ;;  %v2790_v29 = vld [vmem:[#allocation11_spill] sm:$0xff] }
 0x14d   :  { %1338 = vmatpush1.bf16.xpose.msra.mxu0 %v1303_v32  ;;  %1378 = vmatpush1.bf16.xpose.msra.mxu1 %v1305_v58  ;;  %v2794_v32 = vld [vmem:[#allocation16_spill] sm:$0xff] }
 0x14e   :  { %v2795_v58 = vld [vmem:[#allocation20_spill] sm:$0xff] }
 0x150   :  { %s1541_s1 = spop %1540 }
 0x197   :  { %v1141_v20 = vpop.xlane.xlu0 %1140 }
 0x198   :  { %v1146_v19 = vpop.xlane.xlu1 %1145 }
 0x199   :  { %1760 = vrsqrt.f32 %v1146_v19 }
 0x19a   :  { %1762 = vrsqrt.f32 %v1141_v20 }
 0x19e   :  { %v1131_v23 = vpop.xlane.xlu0 %1130 }
 0x19f   :  { %v1136_v48 = vpop.xlane.xlu1 %1135 }
 0x1a0   :  { %1764 = vrsqrt.f32 %v1136_v48 }
 0x1a1   :  { %1766 = vrsqrt.f32 %v1131_v23 }
 0x1a6   :  { %v1761_v3 = vpop.eup %1760 }
 0x1a7   :  { %v1763_v1 = vpop.eup %1762  ;;  %v1244_v16 = vmul.f32 %v1761_v3, %v2544_v24  ;;  %v1246_v15 = vmul.f32 %v1761_v3, %v2581_v43  ;;  %v1243_v17 = vmul.f32 %v1761_v3, %v2539_v57  ;;  %v1245_v18 = vmul.f32 %v1761_v3, %v2565_v22  ;;  %v2792_v43 = vld [vmem:[#allocation14_spill] sm:$0xff] }
 0x1a8   :  { %v1240_v40 = vmul.f32 %v1763_v1, %v2558_v0  ;;  %v1242_v34 = vmul.f32 %v1763_v1, %v2586_v52  ;;  %v1239_v37 = vmul.f32 %v1763_v1, %v2790_v29  ;;  %v1241_v13 = vmul.f32 %v1763_v1, %v2791_v60 }
 0x1aa   :  { %v1300_v21 = vpack.c.bf16 %v1244_v16, %v1240_v40  ;;  %v1302_v39 = vpack.c.bf16 %v1246_v15, %v1242_v34  ;;  %v1299_v26 = vpack.c.bf16 %v1243_v17, %v1239_v37  ;;  %v1301_v31 = vpack.c.bf16 %v1245_v18, %v1241_v13 }
 0x1ac   :  { %1339 = vmatprep.subr.bf16.mxu0 %v1300_v21  ;;  %1379 = vmatprep.subr.bf16.mxu1 %v1302_v39 }
 0x1ad   :  { %1340 = vmatpush1.bf16.xpose.msra.mxu0 %v1299_v26  ;;  %1380 = vmatpush1.bf16.xpose.msra.mxu1 %v1301_v31  ;;  %v1765_v24 = vpop.eup %1764 }
 0x1ae   :  { %v1767_v57 = vpop.eup %1766  ;;  %v1236_v22 = vmul.f32 %v1765_v24, %v2792_v43  ;;  %v1238_v0 = vmul.f32 %v1765_v24, %v2793_v14 }
 0x1af   :  { %v1232_v52 = vmul.f32 %v1767_v57, %v2794_v32 }
 0x1cd   :  { %v982_v44 = vpop.f32.mrf.mxu0  ;;  %v1023_v33 = vpop.f32.mrf.mxu1 }
 0x1ce   :  { %v1030_v53 = vmax.f32 %v982_v44, 0.0  ;;  %v1032_v42 = vmax.f32 %v1023_v33, 0.0  ;;  %v1234_v44 = vmul.f32 %v1767_v57, %v2795_v58  ;;  %v2796_v33 = vld [vmem:[#allocation15_spill] sm:$0xff] }
 0x1cf   :  { %v984_v45 = vpop.f32.mrf.mxu0  ;;  %v1025_v49 = vpop.f32.mrf.mxu1 }
 0x1d0   :  { %v1034_v36 = vmul.f32 0.8, %v1030_v53  ;;  %v1036_v41 = vmul.f32 0.8, %v1032_v42  ;;  %v1031_v59 = vmax.f32 %v984_v45, 0.0  ;;  %v1033_v51 = vmax.f32 %v1025_v49, 0.0 }
 0x1d1   :  { %v986_v50 = vpop.f32.mrf.mxu0  ;;  %v1027_v55 = vpop.f32.mrf.mxu1  ;;  %v1231_v53 = vmul.f32 %v1767_v57, %v2796_v33  ;;  %v2798_v42 = vld [vmem:[#allocation18_spill] sm:$0xff]  ;;  %v1298_v45 = vpack.c.bf16 %v1238_v0, %v1234_v44 }
 0x1d2   :  { %v2711_v62 = vadd.f32 %v1038_v2, %v1034_v36  ;;  %v1035_v5 = vmul.f32 0.8, %v1031_v59  ;;  %v1037_v28 = vmul.f32 0.8, %v1033_v51  ;;  %v2713_v8 = vadd.f32 %v1040_v7, %v1036_v41 }
 0x1d3   :  { %v987_v12 = vpop.f32.mrf.mxu0  ;;  %v1028_v11 = vpop.f32.mrf.mxu1  ;;  %v1235_v2 = vmul.f32 %v1765_v24, %v2797_v35  ;;  %v1233_v54 = vmul.f32 %v1767_v57, %v2798_v42  ;;  %v1296_v7 = vpack.c.bf16 %v1236_v22, %v1232_v52  ;;  %1381 = vmatprep.subr.bf16.mxu1 %v1298_v45  ;;  %v1061_v59 = vstv %s1541_s1 }
 0x1d4   :  { %v1043_v10 = vadd.f32 %v1039_v56, %v1035_v5  ;;  %v1051_v4 = vmul.f32 %v2711_v62, %v2711_v62  ;;  %v1045_v61 = vadd.f32 %v1041_v9, %v1037_v28  ;;  %v1053_v38 = vmul.f32 %v2713_v8, %v2713_v8  ;;  %v2799_v56 = vld [vmem:[#allocation17_spill] sm:$0xff] }
 0x1d5   :  { %v1237_v47 = vmul.f32 %v1765_v24, %v2799_v56  ;;  %v1295_v49 = vpack.c.bf16 %v1235_v2, %v1231_v53  ;;  %1341 = vmatprep.subr.bf16.mxu0 %v1296_v7 }
 0x1d6   :  { %v1052_v6 = vmul.f32 %v1043_v10, %v1043_v10  ;;  %v1054_v63 = vmul.f32 %v1045_v61, %v1045_v61 }
 0x1d7   :  { %v1297_v36 = vpack.c.bf16 %v1237_v47, %v1233_v54  ;;  %1342 = vmatpush1.bf16.xpose.msra.mxu0 %v1295_v49 }
 0x1d8   :  { %v1055_v25 = vadd.f32 %v1052_v6, %v1051_v4 }
 0x1d9   :  { %1382 = vmatpush1.bf16.xpose.msra.mxu1 %v1297_v36 }
 0x1da   :  { %v1056_v30 = vadd.f32 %v1055_v25, %v1053_v38 }
 0x1dc   :  { %v1057_v27 = vadd.f32 %v1056_v30, %v1054_v63 }
 0x1de   :  { %1058 = vadd.xlane.f32.xlu0 %v1057_v27 }
 0x267   :  { %v1059_v41 = vpop.xlane.xlu0 %1058 }
 0x268   :  { %1768 = vrsqrt.f32 %v1059_v41 }
 0x275   :  { %v1769_v51 = vpop.eup %1768 }
 0x276   :  { %v1062_v50 = vmul.f32 %v1769_v51, %v1061_v59 }
 0x278   :  { %v1224_v55 = vmul.f32 %v1062_v50, %v1043_v10  ;;  %v1226_v46 = vmul.f32 %v1062_v50, %v1045_v61  ;;  %v1223_v9 = vmul.f32 %v1062_v50, %v2711_v62  ;;  %v1225_v5 = vmul.f32 %v1062_v50, %v2713_v8 }
 0x27a   :  { %v1228_v28 = vpack.c.bf16 %v1224_v55, %v1224_v55  ;;  %v1230_v12 = vpack.c.bf16 %v1226_v46, %v1226_v46  ;;  %v1227_v11 = vpack.c.bf16 %v1223_v9, %v1223_v9  ;;  %v1229_v4 = vpack.c.bf16 %v1225_v5, %v1225_v5 }
 0x27c   :  { %1359 = vmatprep.mubr.bf16.mxu0 %v1228_v28  ;;  %1399 = vmatprep.mubr.bf16.mxu1 %v1230_v12 }
 0x27d   :  { %1360 = vmatmul.mubr.bf16.vlgmr.msra.gmra.mxu0 %v1227_v11  ;;  %1400 = vmatmul.mubr.bf16.vlgmr.msra.gmra.mxu1 %v1229_v4 }
 0x33d   :  { %v1361_v6 = vpop.f32.mrf.mxu0  ;;  %v1401_v38 = vpop.f32.mrf.mxu1 }
 0x33e   :  { %v1402_v25 = vadd.f32 %v1401_v38, %v1361_v6 }
 0x33f   :  { %v1363_v19 = vpop.f32.mrf.mxu0  ;;  %v1403_v63 = vpop.f32.mrf.mxu1 }
 0x340   :  { %1407 = vst [vmem:[%s2745_s5] sm:$0xff] %v1402_v25 }
 0x341   :  { %v1364_v62 = vpop.f32.mrf.mxu0  ;;  %v1404_v10 = vpop.f32.mrf.mxu1 }
 0x343   :  { %v1365_v8 = vpop.f32.mrf.mxu0  ;;  %v1405_v61 = vpop.f32.mrf.mxu1 }

</bundles_post_ra>
